<compile_context>
chip_gen: v5e
topology: v5e:2x2
jax: 0.10.0
libtpu: 0.0.40
codegen_flags: <defaults>
</compile_context>

<pallas_src>
import jax
import jax.numpy as jnp
from jax.experimental import pallas as pl
from jax.experimental.pallas import tpu as pltpu


def _make_bottleneck_kernel(nk: int, tc: int):
    """Fused kernel for a grid with `nk` channel-reduction steps of width `tc`."""

    def kernel(x_ref, w_ref, s_ref, o_ref):
        # x_ref: (tn, tc, HW)  streamed input block (NCHW with spatial dims flat on lanes)
        # w_ref: (C, 256)      folded weight, VMEM-resident (constant index map)
        # s_ref: (1, 256)      folded shift (bias + BN), VMEM-resident
        # o_ref: (tn, 256)     f32 output block; doubles as the reduction accumulator
        #                      (same block index across the k axis => resident)
        k = pl.program_id(1)

        @pl.when(k == 0)
        def _init():
            o_ref[...] = jnp.zeros_like(o_ref)

        # Spatial sum (the mean's 1/HW is folded into W'); promote to f32 so a bf16
        # input stream still reduces exactly.
        psum = jnp.sum(x_ref[...].astype(jnp.float32), axis=-1)        # (tn, tc)

        if nk == 1:
            w_blk = w_ref[...]                                          # (C, 256)
        else:
            start = pl.multiple_of(k * tc, tc)
            w_blk = w_ref[pl.ds(start, tc), :]                          # (tc, 256)

        o_ref[...] += jnp.dot(psum, w_blk, preferred_element_type=jnp.float32)

        @pl.when(k == nk - 1)
        def _finalize():
            o_ref[...] = jnp.maximum(o_ref[...] + s_ref[...], 0.0).astype(o_ref.dtype)

    return kernel


def _pick_tile(dim, max_tile, multiple):
    """Largest t <= max_tile that divides dim and is a multiple of `multiple`;
    falls back to the full dim (no tiling) if no such tile exists."""
    t = min(dim, max_tile)
    t -= t % multiple
    while t >= multiple:
        if dim % t == 0:
            return t
        t -= multiple
    return dim


def _vmem_capacity_bytes():
    """Physical per-core VMEM (128 MiB on v5e/v6e, 64 MiB on v7x); conservative fallback."""
    try:
        info = pltpu.get_tpu_info()
        for attr in ("vmem_capacity_bytes", "vmem_size_bytes", "vmem_bytes"):
            v = getattr(info, attr, None)
            if v:
                return int(v)
    except Exception:
        pass
    return 64 * 1024 * 1024  # assume the smallest (v7x) if the query is unavailable


def bottleneck_forward(x, w, b, bn_gamma, bn_beta, bn_mean, bn_var, eps=1e-5):
    """Inference-mode forward of `Bottleneck`.

    x: (N, C, H, W).  w: (256, C) PyTorch nn.Linear weight.  b: (256,) bias.
    Returns (N, 256) float32.  Dropout is identity (eval); BN uses running stats.
    """
    N, C, H, W = x.shape
    HW = H * W
    out_features = w.shape[0]

    x_flat = x.reshape(N, C, HW)  # free relayout, no data movement

    # Fold 1/HW, BN scale/shift and the linear bias into a single weight / offset.
    scale = bn_gamma / jnp.sqrt(bn_var + eps)                                # (256,)
    shift = bn_beta - bn_mean * scale                                        # (256,)
    w_folded = (w.T * scale[None, :] / float(HW)).astype(jnp.float32)        # (C, 256)
    shift_folded = (b * scale + shift).reshape(1, out_features).astype(jnp.float32)

    # --- Generation-aware VMEM budgeting -----------------------------------------------
    vmem_cap = _vmem_capacity_bytes()             # 128 MiB (v5e/v6e) or 64 MiB (v7x)
    vmem_limit = (vmem_cap * 3) // 4              # ~96 MiB / ~48 MiB scoped limit
    itemsize = jnp.dtype(x.dtype).itemsize
    w_bytes = C * out_features * 4
    # Resident W' + shift' (double-buffered by the pipeliner) + output/misc headroom.
    resident_bytes = 2 * w_bytes + 2 * out_features * 4 + (2 << 20)
    # Per-x-buffer budget: half of the remaining scoped VMEM (x is double-buffered),
    # capped at 1/4 of physical VMEM (≈32 MiB v5e/v6e, ≈16 MiB v7x).
    x_budget = max(2 << 20, min((vmem_limit - resident_bytes) // 2, vmem_cap // 4))

    # --- Tile selection -----------------------------------------------------------------
    row_bytes = C * HW * itemsize                 # bytes of one batch element's x
    rows_fit = max(1, x_budget // max(1, row_bytes))
    if rows_fit >= 8:
        # Full-C blocks fit: grow the batch tile toward the budget (fewer, larger DMAs).
        tn_cap = min(1024, (rows_fit // 8) * 8)
        tn = _pick_tile(N, tn_cap, 8)
    else:
        tn = _pick_tile(N, 128, 8)
    # Megacore: keep >= 2 blocks on the "parallel" batch axis when N allows, so both
    # v7x TensorCores get work (no effect on single-core v5e/v6e).
    if N // tn < 2 and N >= 16:
        tn = _pick_tile(N, max(8, tn // 2), 8)

    # Channel tile (reduction axis): keep HW full on the lane axis, tile C to the budget.
    tc_max = max(8, x_budget // max(1, tn * HW * itemsize))
    tc = _pick_tile(C, tc_max, 8)
    nk = C // tc
    grid = (N // tn, nk)

    # If the divisor fallback overshot the budget, raise the scoped limit (best effort,
    # stay below physical).  TODO(synk): ragged/padded C tiles for awkward channel counts.
    x_block_bytes = tn * tc * HW * itemsize
    needed = 2 * x_block_bytes + resident_bytes + 2 * tn * out_features * 4
    if needed > vmem_limit:
        vmem_limit = min(vmem_cap - (4 << 20), needed + (2 << 20))

    kernel = _make_bottleneck_kernel(nk, tc)

    return pl.pallas_call(
        kernel,
        out_shape=jax.ShapeDtypeStruct((N, out_features), jnp.float32),
        grid_spec=pltpu.PrefetchScalarGridSpec(
            num_scalar_prefetch=0,
            grid=grid,
            in_specs=[
                pl.BlockSpec((tn, tc, HW), lambda i, k: (i, k, 0)),       # streamed x
                pl.BlockSpec((C, out_features), lambda i, k: (0, 0)),     # resident W'
                pl.BlockSpec((1, out_features), lambda i, k: (0, 0)),     # resident shift'
            ],
            out_specs=pl.BlockSpec((tn, out_features), lambda i, k: (i, 0)),
        ),
        compiler_params=pltpu.CompilerParams(
            dimension_semantics=("parallel", "arbitrary"),
            vmem_limit_bytes=int(vmem_limit),
        ),
    )(x_flat, w_folded, shift_folded)


def _reference(x, w, b, bn_gamma, bn_beta, bn_mean, bn_var, eps=1e-5):
    pooled = jnp.mean(x.astype(jnp.float32), axis=(2, 3))         # (N, C)
    y = pooled @ w.T + b                                          # (N, 256)
    y = (y - bn_mean) / jnp.sqrt(bn_var + eps) * bn_gamma + bn_beta
    return jnp.maximum(y, 0.0)


if __name__ == "__main__":
    OUT = 256
    key = jax.random.PRNGKey(0)

    def run_case(key, N, C, H, W):
        kx, kw, kb = jax.random.split(key, 3)
        x = jax.random.normal(kx, (N, C, H, W), dtype=jnp.float32)
        bound = 1.0 / (C ** 0.5)
        w = jax.random.uniform(kw, (OUT, C), minval=-bound, maxval=bound, dtype=jnp.float32)
        b = jax.random.uniform(kb, (OUT,), minval=-bound, maxval=bound, dtype=jnp.float32)
        # nn.BatchNorm1d(256) default init: gamma=1, beta=0, running_mean=0, running_var=1
        bn_gamma = jnp.ones((OUT,), jnp.float32)
        bn_beta = jnp.zeros((OUT,), jnp.float32)
        bn_mean = jnp.zeros((OUT,), jnp.float32)
        bn_var = jnp.ones((OUT,), jnp.float32)

        out = bottleneck_forward(x, w, b, bn_gamma, bn_beta, bn_mean, bn_var)
        out = jax.block_until_ready(out)
        ref = _reference(x, w, b, bn_gamma, bn_beta, bn_mean, bn_var)
        assert out.shape == (N, OUT)
        assert jnp.allclose(out, ref, atol=1e-5, rtol=1e-5)

    k1, k2 = jax.random.split(key)
    # Small shape consistent with the module (in_features == C after 1x1 pooling).
    run_case(k1, N=2, C=4, H=16, W=16)
    # Second small case exercising multiple batch tiles on the "parallel" grid axis.
    run_case(k2, N=16, C=32, H=8, W=8)

    print("KERNEL_OK")
</pallas_src>

<mosaic_0001>
module attributes {stable_mosaic.version = 11 : i64} {
  func.func @kernel(%arg0: i32, %arg1: i32, %arg2: memref<2x4x256xf32, #tpu.memory_space<vmem>>, %arg3: memref<4x256xf32, #tpu.memory_space<vmem>>, %arg4: memref<1x256xf32, #tpu.memory_space<vmem>>, %arg5: memref<2x256xf32, #tpu.memory_space<vmem>>) attributes {dimension_semantics = [#tpu.dimension_semantics<parallel>, #tpu.dimension_semantics<arbitrary>], iteration_bounds = array<i64: 1, 1>, scalar_prefetch = 0 : i64, scratch_operands = 0 : i64, tpu.core_type = #tpu.core_type<tc>, window_params = [{transform_indices = @transform_0, window_bounds = array<i64: 2, 4, 256>}, {pipeline_mode = #tpu.pipeline_mode<synchronous>, transform_indices = @transform_1, window_bounds = array<i64: 4, 256>}, {pipeline_mode = #tpu.pipeline_mode<synchronous>, transform_indices = @transform_2, window_bounds = array<i64: 1, 256>}, {transform_indices = @transform_3, window_bounds = array<i64: 2, 256>}]} {
    %c0_i32 = arith.constant 0 : i32
    %0 = arith.cmpi eq, %arg1, %c0_i32 : i32
    %1 = arith.extui %0 : i1 to i32
    %c0_i32_0 = arith.constant 0 : i32
    %2 = arith.cmpi ne, %1, %c0_i32_0 : i32
    scf.if %2 {
      %cst_12 = arith.constant 0.000000e+00 : f32
      %13 = vector.broadcast %cst_12 : f32 to vector<2x256xf32>
      %c0_13 = arith.constant 0 : index
      %c0_14 = arith.constant 0 : index
      %14 = vector.load %arg5[%c0_13, %c0_14] : memref<2x256xf32, #tpu.memory_space<vmem>>, vector<2x256xf32>
      tpu.vector_store %arg5[%c0_13, %c0_14], %13 {strides = array<i32>} : memref<2x256xf32, #tpu.memory_space<vmem>>, vector<2x256xf32>,
    } else {
    }
    %c0 = arith.constant 0 : index
    %c0_1 = arith.constant 0 : index
    %c0_2 = arith.constant 0 : index
    %3 = vector.load %arg2[%c0, %c0_1, %c0_2] : memref<2x4x256xf32, #tpu.memory_space<vmem>>, vector<2x4x256xf32>
    %cst = arith.constant dense<0.000000e+00> : vector<2x4xf32>
    %4 = vector.multi_reduction <add>, %3, %cst [2] : vector<2x4x256xf32> to vector<2x4xf32>
    %c0_3 = arith.constant 0 : index
    %c0_4 = arith.constant 0 : index
    %5 = vector.load %arg3[%c0_3, %c0_4] : memref<4x256xf32, #tpu.memory_space<vmem>>, vector<4x256xf32>
    %c0_5 = arith.constant 0 : index
    %c0_6 = arith.constant 0 : index
    %6 = vector.load %arg5[%c0_5, %c0_6] : memref<2x256xf32, #tpu.memory_space<vmem>>, vector<2x256xf32>
    %cst_7 = arith.constant dense<0.000000e+00> : vector<2x256xf32>
    %7 = tpu.matmul %4, %5, %cst_7 {dimension_numbers = #tpu.dot_dimension_numbers<[1], [0], [0], [1], [0, 0, 1, 1], [], []>} : vector<2x4xf32>, vector<4x256xf32>, vector<2x256xf32> -> vector<2x256xf32>
    %8 = arith.addf %6, %7 : vector<2x256xf32>
    %c0_8 = arith.constant 0 : index
    %c0_9 = arith.constant 0 : index
    %9 = vector.load %arg5[%c0_8, %c0_9] : memref<2x256xf32, #tpu.memory_space<vmem>>, vector<2x256xf32>
    tpu.vector_store %arg5[%c0_8, %c0_9], %8 {strides = array<i32>} : memref<2x256xf32, #tpu.memory_space<vmem>>, vector<2x256xf32>,
    %c0_i32_10 = arith.constant 0 : i32
    %10 = arith.cmpi eq, %arg1, %c0_i32_10 : i32
    %11 = arith.extui %10 : i1 to i32
    %c0_i32_11 = arith.constant 0 : i32
    %12 = arith.cmpi ne, %11, %c0_i32_11 : i32
    scf.if %12 {
      %c0_12 = arith.constant 0 : index
      %c0_13 = arith.constant 0 : index
      %13 = vector.load %arg5[%c0_12, %c0_13] : memref<2x256xf32, #tpu.memory_space<vmem>>, vector<2x256xf32>
      %c0_14 = arith.constant 0 : index
      %c0_15 = arith.constant 0 : index
      %14 = vector.load %arg4[%c0_14, %c0_15] : memref<1x256xf32, #tpu.memory_space<vmem>>, vector<1x256xf32>
      %15 = vector.broadcast %14 : vector<1x256xf32> to vector<2x256xf32>
      %16 = arith.addf %13, %15 : vector<2x256xf32>
      %cst_16 = arith.constant 0.000000e+00 : f32
      %17 = vector.broadcast %cst_16 : f32 to vector<2x256xf32>
      %18 = arith.maximumf %16, %17 : vector<2x256xf32>
      %c0_17 = arith.constant 0 : index
      %c0_18 = arith.constant 0 : index
      %19 = vector.load %arg5[%c0_17, %c0_18] : memref<2x256xf32, #tpu.memory_space<vmem>>, vector<2x256xf32>
      tpu.vector_store %arg5[%c0_17, %c0_18], %18 {strides = array<i32>} : memref<2x256xf32, #tpu.memory_space<vmem>>, vector<2x256xf32>,
    } else {
    }
    return
  }
  func.func @transform_0(%arg0: i32, %arg1: i32) -> (i32, i32, i32) {
    %c0_i32 = arith.constant 0 : i32
    %c0_i32_0 = arith.constant 0 : i32
    return %arg0, %arg1, %c0_i32 : i32, i32, i32
  }
  func.func @transform_1(%arg0: i32, %arg1: i32) -> (i32, i32) {
    %c0_i32 = arith.constant 0 : i32
    %c0_i32_0 = arith.constant 0 : i32
    %c0_i32_1 = arith.constant 0 : i32
    return %c0_i32, %c0_i32_0 : i32, i32
  }
  func.func @transform_2(%arg0: i32, %arg1: i32) -> (i32, i32) {
    %c0_i32 = arith.constant 0 : i32
    %c0_i32_0 = arith.constant 0 : i32
    %c0_i32_1 = arith.constant 0 : i32
    return %c0_i32, %c0_i32_0 : i32, i32
  }
  func.func @transform_3(%arg0: i32, %arg1: i32) -> (i32, i32) {
    %c0_i32 = arith.constant 0 : i32
    %c0_i32_0 = arith.constant 0 : i32
    return %arg0, %c0_i32 : i32, i32
  }
}

</mosaic_0001>

<bundles_post_ra>
// kernel: tpu_custom_call.1
= control target key start
LH: loop header
LB: loop body
LE: loop exit
PB: predicated region body
PF: predicated region fallthrough
CT: control target
= control target key end

     0   :  { %8 = vsyncpa [#allocation3], 0  ;;  %s348_s0 = inlined_call_operand.hbm [shape: f32[2,4,256], index: 0, kind: input, shape index: {}]   ;;  %s349_s1 = inlined_call_operand.hbm [shape: f32[4,256], index: 1, kind: input, shape index: {}]   ;;  %s350_s2 = inlined_call_operand.hbm [shape: f32[1,256], index: 2, kind: input, shape index: {}]   ;;  %s351_s3 = inlined_call_operand.hbm [shape: f32[2,256], index: 3, kind: output, shape index: {}]  }
   0x1   :  { %9 = vsyncpa [#allocation6], 0  ;;  %s29_s14 = sshll.u32 %s349_s1, 4  ;;  %s30_s14 = int_to_ptr.hbm [resolvable:$true] %s29_s14 }
   0x2   :  { %10 = vsyncpa [#allocation4], 0  ;;  %s303_s15 = smov [#allocation5]   ;;  %s15_s19 = sshll.u32 %s348_s0, 4  ;;  %s16_s19 = int_to_ptr.hbm [resolvable:$true] %s15_s19 }
   0x3   :  { %s31_s16 = sshll.u32 %s303_s15, 4  ;;  %s304_s20 = smov [#allocation2]   ;;  %s32_s16 = int_to_ptr.vmem [resolvable:$true] %s31_s16 }
   0x4   :  { %34 = dma.hbm_to_vmem [thread:$0]  %s30_s14, 128, %s32_s16, [#allocation6]  }
   0x5   :  { %s17_s21 = sshll.u32 %s304_s20, 4  ;;  %s305_s22 = smov 128   ;;  %s18_s21 = int_to_ptr.vmem [resolvable:$true] %s17_s21 }
   0x6   :  { %s306_s23 = smov 8   ;;  %s40_s1 = sshll.u32 %s350_s2, 4  ;;  %s41_s1 = int_to_ptr.hbm [resolvable:$true] %s40_s1 }
   0x7   :  { %23 = dma.hbm_to_vmem [thread:$0]  %s16_s19, 256, %s18_s21, [#allocation3], %s305_s22, %s305_s22, %s306_s23  }
   0x8   :  { %s307_s26 = smov [#allocation7]  }
   0x9   :  { %s42_s27 = sshll.u32 %s307_s26, 4  ;;  %s43_s27 = int_to_ptr.vmem [resolvable:$true] %s42_s27 }
   0xa   :  { %45 = dma.hbm_to_vmem [thread:$0]  %s41_s1, 32, %s43_s27, [#allocation6]  }
   0xb   :  { %297 = dma.done.wait [#allocation3], 256  }
   0xc   :  { %298 = vsyncadd [#allocation3], 4294967040 }
   0xd   :  { %299 = dma.done.wait [#allocation6], 160  }
   0xe   :  { %300 = vsyncadd [#allocation6], 4294967136  ;;  %v63_v0 = vld [vmem:[#allocation2] sm:$0xff]  ;;  %v64_v1 = vld [vmem:[#allocation2 + $0x8] sm:$0xff]  ;;  %vm78_vm0 = vcmask 1043456   ;;  %v93_v16 = vlaneseq  ;;  %vm97_vm1 = vcmask 1041409  }
   0xf   :  { %67 = vst [vmem:[#allocation1] ss:$2 sm:$0xff] %v63_v0  ;;  %v89_v2 = vld [vmem:[#allocation5] sm:$0xff]  ;;  %vm103_vm2 = vcmask 31744   ;;  %v308_v22 = vmov 0.0   ;;  %vm153_vm3 = vcmask 1041408  }
  0x10   :  { %71 = vst [vmem:[#allocation1 + $0x10] ss:$2 sm:$0xff] %v64_v1  ;;  %v94_v17 = vand.u32 127, %v93_v16  ;;  %v162_v24 = vld [vmem:[#allocation7] sm:$0x3]  ;;  %s309_s0 = smov [#allocation8]  }
  0x11   :  { %62 = vst [vmem:[#allocation8] sm:$0xf] %v308_v22  ;;  %v165_v29 = vperm.slane %v162_v24, 1  ;;  %v164_v31 = vperm.slane %v162_v24, 0  ;;  %s177_s2 = sshll.u32 %s309_s0, 4  ;;  %s179_s30 = sshll.u32 %s351_s3, 4  ;;  %s178_s2 = int_to_ptr.vmem [resolvable:$true] %s177_s2  ;;  %s180_s30 = int_to_ptr.hbm [resolvable:$true] %s179_s30 }
  0x13   :  { %v166_v32 = vrot.slane %v165_v29, 6 }
  0x15   :  { %v167_v33 = vsel %vm153_vm3, %v164_v31, %v166_v32 }
  0x16   :  { %v68_v3 = vld.sshfl [vmem:[#allocation1] sm:$0xff pattern:$0x75316420]  ;;  %v69_v4 = vld.sshfl [vmem:[#allocation1 + $0x8] sm:$0xff pattern:$0x75316420] }
  0x17   :  { %v79_v5 = vsel %vm78_vm0, %v68_v3, 0.0  ;;  %v80_v6 = vsel %vm78_vm0, %v69_v4, 0.0  ;;  %100 = vst [vmem:[#allocation1] ss:$2 sm:$0xff] %v89_v2 }
  0x18   :  { %v81_v7 = vadd.f32 %v80_v6, %v79_v5  ;;  %v72_v8 = vld.sshfl [vmem:[#allocation1 + $0x10] sm:$0xff pattern:$0x75316420]  ;;  %v73_v9 = vld.sshfl [vmem:[#allocation1 + $0x18] sm:$0xff pattern:$0x75316420] }
  0x19   :  { %v84_v10 = vsel %vm78_vm0, %v72_v8, 0.0  ;;  %v85_v11 = vsel %vm78_vm0, %v73_v9, 0.0  ;;  %v90_v25 = vld [vmem:[#allocation8] sm:$0xf] }
  0x1a   :  { %82 = vadd.xlane.f32.xlu0 %v81_v7  ;;  %v86_v12 = vadd.f32 %v85_v11, %v84_v10 }
  0x1e   :  { %v101_v13 = vld.sshfl [vmem:[#allocation1] sm:$0xff pattern:$0x75316420]  ;;  %v102_v14 = vld.sshfl [vmem:[#allocation1 + $0x8] sm:$0xff pattern:$0x75316420] }
  0x1f   :  { %190 = vmatpush.msk.msra.mxu0 %vm78_vm0, %v101_v13  ;;  %192 = vmatpush.msk.msra.mxu1 %vm78_vm0, %v102_v14 }
  0x22   :  { %87 = vadd.xlane.f32.xlu0 %v86_v12 }
  0x8d   :  { %v83_v15 = vpop.xlane.xlu0 %82 }
  0x8e   :  { %v95_v19 = vperm.slane %v83_v15, %v94_v17 }
  0x95   :  { %v88_v18 = vpop.xlane.xlu0 %87 }
  0x96   :  { %v96_v20 = vperm.slane %v88_v18, %v94_v17 }
  0x98   :  { %v98_v21 = vsel %vm97_vm1, %v96_v20, %v95_v19 }
  0x99   :  { %191 = vmatmul.msk.f32.vlgmr.msra.gmra.mxu0 %vm103_vm2, %v98_v21  ;;  %193 = vmatmul.msk.f32.vlgmr.msra.gmra.mxu1 %vm103_vm2, %v98_v21 }
 0x116   :  { %v147_v23 = vpop.f32.mrf.mxu1  ;;  %v127_v27 = vpop.f32.mrf.mxu0 }
 0x117   :  { %v152_v26 = vrot.slane %v147_v23, 6 }
 0x119   :  { %v154_v28 = vsel %vm153_vm3, %v127_v27, %v152_v26 }
 0x11a   :  { %v156_v30 = vadd.f32 %v154_v28, %v90_v25 }
 0x11c   :  { %157 = vst [vmem:[#allocation8] sm:$0xf] %v156_v30 }
 0x123   :  { %v161_v34 = vld [vmem:[#allocation8] sm:$0xf] }
 0x124   :  { %v169_v35 = vadd.f32 %v167_v33, %v161_v34 }
 0x126   :  { %v170_v36 = vmax.f32 %v169_v35, 0.0 }
 0x128   :  { %171 = vst [vmem:[#allocation8] sm:$0xf] %v170_v36 }
 0x129   :  { %182 = dma.vmem_to_hbm [thread:$0]  %s178_s2, 64, %s180_s30, [#allocation4]  }
 0x12a   :  { %301 = dma.done.wait [#allocation4], 64  }
 0x12b   :  { %302 = vsyncadd [#allocation4], 4294967232 }
 0x12c   :  { %187 = vsyncpa [#allocation3], 1 }
 0x12d   :  { %188 = vsyncpa [#allocation6], 1 }
 0x12e   :  { %189 = vsyncpa [#allocation4], 1 }

</bundles_post_ra>
